<compile_context>
chip_gen: v7x
topology: tpu7x:2x2x1
jax: 0.10.0
libtpu: 0.0.40
codegen_flags: <defaults>
</compile_context>

<pallas_src>
import functools

import jax
import jax.numpy as jnp
from jax.experimental import pallas as pl
from jax.experimental.pallas import tpu as pltpu

P_DROP = 0.1
# Keep-threshold on 31 uniform random bits (int() truncation vs exact 0.9*2^31
# changes keep probability by ~5e-10 — negligible).
_KEEP_31 = int((1.0 - P_DROP) * (1 << 31))
_INV_KEEP = 1.0 / (1.0 - P_DROP)

# murmur3-style mixing constants as int32 (two's complement) for the fallback.
_C_GOLDEN = -1640531535   # 0x9E3779B1
_C_MIX1 = -2048144789     # 0x85EBCA6B
_C_MIX2 = -1028477379     # 0xC2B2AE35


def _keep_mask_hw(seed_scalar, shape):
    """Bernoulli(1-p) keep mask from the TPU hardware PRNG (Mosaic only)."""
    pltpu.prng_seed(seed_scalar)
    bits = pltpu.prng_random_bits(shape)
    if bits.dtype != jnp.int32:
        bits = pltpu.bitcast(bits, jnp.int32)
    # Mask the sign bit -> uniform over [0, 2^31); signed compare is cheap.
    return (bits & jnp.int32(0x7FFFFFFF)) < jnp.int32(_KEEP_31)


def _keep_mask_hash(seed_scalar, base_head, base_q, s_total, shape):
    """Portable counter-hash keep mask (non-TPU interpret fallback only)."""
    g_io = jax.lax.broadcasted_iota(jnp.int32, shape, 0)
    q_io = jax.lax.broadcasted_iota(jnp.int32, shape, 1)
    k_io = jax.lax.broadcasted_iota(jnp.int32, shape, 2)
    counter = ((base_head + g_io) * s_total + base_q + q_io) * s_total + k_io
    x = counter * jnp.int32(_C_GOLDEN) + seed_scalar
    x = x ^ (x >> 15)
    x = x * jnp.int32(_C_MIX1)
    x = x ^ (x >> 13)
    x = x * jnp.int32(_C_MIX2)
    x = x ^ (x >> 16)
    return (x & jnp.int32(0x7FFFFFFF)) < jnp.int32(_KEEP_31)


def _dropout_matmul_kernel(seed_ref, a_ref, b_ref, o_ref, *,
                           group, tq, s_total, use_hw_prng, apply_dropout):
    """Per grid step (i=head-group, j=query-tile):

    a_ref: (G, TQ, S) f32   attention block
    b_ref: (G, S, D)  f32   values block (same across all j for a given i)
    o_ref: (G, TQ, D) f32   output block
    seed_ref: SMEM scalar-prefetch int32 seed
    """
    i = pl.program_id(0)
    j = pl.program_id(1)
    nq = pl.num_programs(1)

    a = a_ref[...]
    b = b_ref[...]

    if apply_dropout:
        if use_hw_prng:
            keep = _keep_mask_hw(seed_ref[0] + i * nq + j, a.shape)
        else:
            keep = _keep_mask_hash(seed_ref[0], i * group, j * tq, s_total, a.shape)
        # Select only (no per-element scale) — 1/(1-p) is folded into the
        # (TQ x D) matmul output below, which is far less work than S x S.
        a = jnp.where(keep, a, jnp.zeros_like(a))

    # Cast to bf16 per tile right before the MXU; accumulation stays f32.
    # TODO(synk): bf16 x bf16 MXU matmul is a deliberate, documented numerical
    # divergence from torch's f32 matmul (loose-tolerance equivalent).
    acc = jnp.einsum("gqk,gkd->gqd",
                     a.astype(jnp.bfloat16), b.astype(jnp.bfloat16),
                     preferred_element_type=jnp.float32)
    if apply_dropout:
        acc = acc * jnp.float32(_INV_KEEP)
    o_ref[...] = acc.astype(o_ref.dtype)


def _vmem_limit_bytes():
    """Generation-aware scoped-VMEM limit (64 MiB on v7x, 128 MiB v5e/v6e)."""
    cap = 64 * 1024 * 1024  # conservative default = v7x per-TC capacity
    try:
        info = pltpu.get_tpu_info()
        cap = int(getattr(info, "vmem_capacity_bytes", cap))
    except Exception:
        pass
    return max(32 * 1024 * 1024, min(int(cap * 0.75), cap - 16 * 1024 * 1024))


def _pick_tiles(bh, s, d, vmem_budget, target_payload=1 << 20):
    """Pick (head-group G, query-tile TQ).

    Goals: per-step attn DMA payload near ~1 MB (so the ~0.35 us/step fixed
    overhead is amortized on all generations), >= 8 grid steps when possible
    (software pipelining + v7x megacore sharding), and the double-buffered
    tiles PLUS in-kernel intermediates (int32 PRNG bits, masked bf16 copy of
    attn, bf16 values, f32 accumulator) within the VMEM budget.
    """
    def footprint(g, t):
        attn_tile = g * t * s * 4
        val_tile = g * s * d * 4
        out_tile = g * t * d * 4
        pipelined = 2 * (attn_tile + val_tile + out_tile)       # double-buffered
        scratch = g * t * s * (4 + 2) + g * s * d * 2 + g * t * d * 4
        return pipelined + scratch

    g_cands = [g for g in range(1, bh + 1) if bh % g == 0]
    tq_cands = [t for t in range(8, s + 1, 8) if s % t == 0] or [s]

    best_key, best = None, (1, tq_cands[0])
    for g in g_cands:
        for t in tq_cands:
            if footprint(g, t) > vmem_budget:
                continue
            steps = (bh // g) * (s // t)
            payload = g * t * s * 4
            key = (min(steps, 8), -abs(payload - target_payload), t)
            if best_key is None or key > best_key:
                best_key, best = key, (g, t)
    return best


@functools.partial(jax.jit, static_argnames=("training",))
def dropout_matmul(attn, values, seed=0, training=True):
    """attn: [B, H, S, S] f32, values: [B, H, S, D] f32 -> [B, H, S, D] f32."""
    B, H, S, S2 = attn.shape
    _, _, _, D = values.shape
    BH = B * H

    vmem_limit = _vmem_limit_bytes()
    G, TQ = _pick_tiles(BH, S, D, int(vmem_limit * 0.6))

    # Reshapes are views — no extra HBM pass over the dominant tensor.
    attn_r = attn.reshape(BH, S, S2)
    val_r = values.reshape(BH, S, D)
    # Traced seed (scalar prefetch) -> changing the seed never recompiles.
    seed_arr = jnp.asarray(seed, dtype=jnp.int32).reshape((1,))

    kernel = functools.partial(
        _dropout_matmul_kernel,
        group=G,
        tq=TQ,
        s_total=S,
        use_hw_prng=(jax.default_backend() == "tpu"),
        apply_dropout=training,
    )

    cost = pl.CostEstimate(
        flops=2 * BH * S * S2 * D,
        transcendentals=0,
        bytes_accessed=BH * S * S2 * 4 + BH * S * D * 4 + BH * S * D * 4,
    )

    out = pl.pallas_call(
        kernel,
        out_shape=jax.ShapeDtypeStruct((BH, S, D), jnp.float32),
        grid_spec=pltpu.PrefetchScalarGridSpec(
            num_scalar_prefetch=1,
            grid=(BH // G, S // TQ),
            in_specs=[
                # attn: advances along both head-group and query-tile axes.
                pl.BlockSpec((G, TQ, S2), lambda i, j, seed: (i, j, 0)),
                # values: independent of j -> Pallas skips the re-DMA across
                # consecutive query-tile steps of the same head group.
                pl.BlockSpec((G, S, D), lambda i, j, seed: (i, 0, 0)),
            ],
            out_specs=pl.BlockSpec((G, TQ, D), lambda i, j, seed: (i, j, 0)),
        ),
        compiler_params=pltpu.CompilerParams(
            # Each step reseeds its own PRNG stream -> steps are independent,
            # so both axes can be sharded across v7x TensorCores.
            dimension_semantics=("parallel", "parallel"),
            vmem_limit_bytes=vmem_limit,
        ),
        cost_estimate=cost,
    )(seed_arr, attn_r, val_r)

    return out.reshape(B, H, S, D)


if __name__ == "__main__":
    # Small shapes consistent with the module ([1, 12, 384, 64] values,
    # [1, 12, 384, 384] attention).
    B, H, S, D = 1, 4, 128, 64
    key = jax.random.PRNGKey(0)
    k94, k83 = jax.random.split(key)
    x94 = jax.random.normal(k94, (B, H, S, S), dtype=jnp.float32)
    x83 = jax.random.normal(k83, (B, H, S, D), dtype=jnp.float32)

    # Training mode (dropout applied) — matches the PyTorch module's forward.
    # TODO(synk): dropout RNG stream will not match torch's bit-for-bit.
    out = dropout_matmul(x94, x83, seed=0)
    out = jax.block_until_ready(out)
    assert out.shape == (B, H, S, D), out.shape
    assert out.dtype == jnp.float32, out.dtype
    assert bool(jnp.all(jnp.isfinite(out)))

    # Different seed must not trigger a recompile and should give a different mask.
    out2 = jax.block_until_ready(dropout_matmul(x94, x83, seed=123))
    assert out2.shape == (B, H, S, D)

    # Eval-mode path (no dropout) checked against a matmul reference
    # (kernel computes bf16 x bf16 with f32 accumulation -> loose tolerance).
    out_eval = jax.block_until_ready(dropout_matmul(x94, x83, seed=0, training=False))
    ref = jnp.einsum(
        "bhqk,bhkd->bhqd",
        x94.astype(jnp.bfloat16), x83.astype(jnp.bfloat16),
        preferred_element_type=jnp.float32,
    )
    assert bool(jnp.allclose(out_eval, ref, rtol=2e-2, atol=2e-1))

    print("KERNEL_OK")
</pallas_src>

<mosaic_0001>
module attributes {stable_mosaic.version = 11 : i64} {
  func.func @_dropout_matmul_kernel(%arg0: i32, %arg1: i32, %arg2: memref<1xi32, #tpu.memory_space<smem>>, %arg3: memref<1x64x128xf32, #tpu.memory_space<vmem>>, %arg4: memref<1x128x64xf32, #tpu.memory_space<vmem>>, %arg5: memref<1x64x64xf32, #tpu.memory_space<vmem>>) attributes {dimension_semantics = [#tpu.dimension_semantics<parallel>, #tpu.dimension_semantics<parallel>], iteration_bounds = array<i64: 4, 2>, scalar_prefetch = 1 : i64, scratch_operands = 0 : i64, tpu.core_type = #tpu.core_type<tc>, window_params = [{transform_indices = @transform_0, window_bounds = array<i64: 1, 64, 128>}, {transform_indices = @transform_1, window_bounds = array<i64: 1, 128, 64>}, {transform_indices = @transform_2, window_bounds = array<i64: 1, 64, 64>}]} {
    %c0 = arith.constant 0 : index
    %c0_0 = arith.constant 0 : index
    %c0_1 = arith.constant 0 : index
    %0 = vector.load %arg3[%c0, %c0_0, %c0_1] : memref<1x64x128xf32, #tpu.memory_space<vmem>>, vector<1x64x128xf32>
    %c0_2 = arith.constant 0 : index
    %c0_3 = arith.constant 0 : index
    %c0_4 = arith.constant 0 : index
    %1 = vector.load %arg4[%c0_2, %c0_3, %c0_4] : memref<1x128x64xf32, #tpu.memory_space<vmem>>, vector<1x128x64xf32>
    %c0_5 = arith.constant 0 : index
    %2 = memref.load %arg2[%c0_5] : memref<1xi32, #tpu.memory_space<smem>>
    %c1_i32 = arith.constant 1 : i32
    %3 = arith.muli %arg0, %c1_i32 : i32
    %c64_i32 = arith.constant 64 : i32
    %4 = arith.muli %arg1, %c64_i32 : i32
    %5 = tpu.iota {dimensions = array<i32: 0>} : vector<1x64x128xi32>
    %6 = tpu.iota {dimensions = array<i32: 1>} : vector<1x64x128xi32>
    %7 = tpu.iota {dimensions = array<i32: 2>} : vector<1x64x128xi32>
    %8 = vector.broadcast %3 : i32 to vector<1x64x128xi32>
    %9 = arith.addi %8, %5 : vector<1x64x128xi32>
    %c128_i32 = arith.constant 128 : i32
    %10 = vector.broadcast %c128_i32 : i32 to vector<1x64x128xi32>
    %11 = arith.muli %9, %10 : vector<1x64x128xi32>
    %12 = vector.broadcast %4 : i32 to vector<1x64x128xi32>
    %13 = arith.addi %11, %12 : vector<1x64x128xi32>
    %14 = arith.addi %13, %6 : vector<1x64x128xi32>
    %c128_i32_6 = arith.constant 128 : i32
    %15 = vector.broadcast %c128_i32_6 : i32 to vector<1x64x128xi32>
    %16 = arith.muli %14, %15 : vector<1x64x128xi32>
    %17 = arith.addi %16, %7 : vector<1x64x128xi32>
    %c-1640531535_i32 = arith.constant -1640531535 : i32
    %18 = vector.broadcast %c-1640531535_i32 : i32 to vector<1x64x128xi32>
    %19 = arith.muli %17, %18 : vector<1x64x128xi32>
    %20 = vector.broadcast %2 : i32 to vector<1x64x128xi32>
    %21 = arith.addi %19, %20 : vector<1x64x128xi32>
    %c15_i32 = arith.constant 15 : i32
    %22 = vector.broadcast %c15_i32 : i32 to vector<1x64x128xi32>
    %23 = arith.shrsi %21, %22 : vector<1x64x128xi32>
    %24 = arith.xori %21, %23 : vector<1x64x128xi32>
    %c-2048144789_i32 = arith.constant -2048144789 : i32
    %25 = vector.broadcast %c-2048144789_i32 : i32 to vector<1x64x128xi32>
    %26 = arith.muli %24, %25 : vector<1x64x128xi32>
    %c13_i32 = arith.constant 13 : i32
    %27 = vector.broadcast %c13_i32 : i32 to vector<1x64x128xi32>
    %28 = arith.shrsi %26, %27 : vector<1x64x128xi32>
    %29 = arith.xori %26, %28 : vector<1x64x128xi32>
    %c-1028477379_i32 = arith.constant -1028477379 : i32
    %30 = vector.broadcast %c-1028477379_i32 : i32 to vector<1x64x128xi32>
    %31 = arith.muli %29, %30 : vector<1x64x128xi32>
    %c16_i32 = arith.constant 16 : i32
    %32 = vector.broadcast %c16_i32 : i32 to vector<1x64x128xi32>
    %33 = arith.shrsi %31, %32 : vector<1x64x128xi32>
    %34 = arith.xori %31, %33 : vector<1x64x128xi32>
    %c2147483647_i32 = arith.constant 2147483647 : i32
    %35 = vector.broadcast %c2147483647_i32 : i32 to vector<1x64x128xi32>
    %36 = arith.andi %34, %35 : vector<1x64x128xi32>
    %c1932735283_i32 = arith.constant 1932735283 : i32
    %37 = vector.broadcast %c1932735283_i32 : i32 to vector<1x64x128xi32>
    %38 = arith.cmpi slt, %36, %37 : vector<1x64x128xi32>
    %cst = arith.constant 0.000000e+00 : f32
    %39 = vector.broadcast %cst : f32 to vector<1x64x128xf32>
    %40 = arith.select %38, %0, %39 : vector<1x64x128xi1>, vector<1x64x128xf32>
    %41 = arith.truncf %40 : vector<1x64x128xf32> to vector<1x64x128xbf16>
    %42 = arith.truncf %1 : vector<1x128x64xf32> to vector<1x128x64xbf16>
    "tpu.trace_start"() <{level = 10 : i32, message = "gqk,gkd->gqd"}> : () -> ()
    %cst_7 = arith.constant dense<0.000000e+00> : vector<1x64x64xf32>
    %43 = tpu.matmul %41, %42, %cst_7 {dimension_numbers = #tpu.dot_dimension_numbers<[2], [1], [1], [2], [0, 0, 0, 1, 1, 2], [0], [0]>} : vector<1x64x128xbf16>, vector<1x128x64xbf16>, vector<1x64x64xf32> -> vector<1x64x64xf32>
    "tpu.trace_stop"() : () -> ()
    %cst_8 = arith.constant 1.11111116 : f32
    %44 = vector.broadcast %cst_8 : f32 to vector<1x64x64xf32>
    %45 = arith.mulf %43, %44 : vector<1x64x64xf32>
    %c0_9 = arith.constant 0 : index
    %c0_10 = arith.constant 0 : index
    %c0_11 = arith.constant 0 : index
    %46 = vector.load %arg5[%c0_9, %c0_10, %c0_11] : memref<1x64x64xf32, #tpu.memory_space<vmem>>, vector<1x64x64xf32>
    tpu.vector_store %arg5[%c0_9, %c0_10, %c0_11], %45 {strides = array<i32>} : memref<1x64x64xf32, #tpu.memory_space<vmem>>, vector<1x64x64xf32>,
    return
  }
  func.func @transform_0(%arg0: i32, %arg1: i32, %arg2: memref<1xi32, #tpu.memory_space<smem>>) -> (i32, i32, i32) {
    %c0_i32 = arith.constant 0 : i32
    %c0_i32_0 = arith.constant 0 : i32
    return %arg0, %arg1, %c0_i32 : i32, i32, i32
  }
  func.func @transform_1(%arg0: i32, %arg1: i32, %arg2: memref<1xi32, #tpu.memory_space<smem>>) -> (i32, i32, i32) {
    %c0_i32 = arith.constant 0 : i32
    %c0_i32_0 = arith.constant 0 : i32
    %c0_i32_1 = arith.constant 0 : i32
    return %arg0, %c0_i32, %c0_i32_0 : i32, i32, i32
  }
  func.func @transform_2(%arg0: i32, %arg1: i32, %arg2: memref<1xi32, #tpu.memory_space<smem>>) -> (i32, i32, i32) {
    %c0_i32 = arith.constant 0 : i32
    %c0_i32_0 = arith.constant 0 : i32
    return %arg0, %arg1, %c0_i32 : i32, i32, i32
  }
}

</mosaic_0001>

<bundles_post_ra>
// kernel: dropout_matmul.1
= control target key start
LH: loop header
LB: loop body
LE: loop exit
PB: predicated region body
PF: predicated region fallthrough
CT: control target
= control target key end

     0   :  { %s756_s14 = smov 0   ;;  %s758_s15 = smov 0   ;;  %s919_s0 = inlined_call_operand.<no memory space> [shape: s32[1], index: 0, kind: input, shape index: {}]   ;;  %s920_s1 = inlined_call_operand.vmem [shape: f32[4,128,128], index: 1, kind: input, shape index: {}]   ;;  %s921_s2 = inlined_call_operand.vmem [shape: f32[4,128,64], index: 2, kind: input, shape index: {}]   ;;  %s922_s3 = inlined_call_operand.vmem [shape: f32[4,128,64], index: 3, kind: output, shape index: {}]  }
   0x1   :  { %8 = sst [smem:[#allocation3]] %s919_s0  ;;  %s760_s16 = smov 0  }
   0x2   :  { %s762_s17 = smov 0   ;;  %s764_s18 = smov 0  }
   0x3 LB: > { %s23_s0 = sadd.s32 1, %s723_s16  ;;  %s26_s19 = sadd.s32 1, %s727_s17  ;;  %s731_s18 = sphi %s764_s18, %s14_s18   ;;  %s727_s17 = sphi %s762_s17, %s926_s17   ;;  %s723_s16 = sphi %s760_s16, %s925_s16   ;;  %s719_s15 = sphi %s758_s15, %s924_s15   ;;  %s715_s14 = sphi %s756_s14, %s923_s14  }
   0x4   : > { %p24_p0 = scmp.ge.s32.totalorder %s23_s0, 2  ;;  %p576_p1 = scmp.ge.s32.totalorder %s731_s18, 1 }
   0x5   : > { %p145_p2 = scmp.lt.s32.totalorder %s731_s18, 9 }
   0x6   : > { %s928_s0 = smov (%p24_p0, %s23_s0), 0  ;;  %s930_s19 = smov (!%p24_p0, %s26_s19), %s727_s17 }
   0x7   : > { %p146_p3 = pnand %p576_p1, %p145_p2  ;;  %p28_p4 = scmp.ge.s32.totalorder %s930_s19, 4 }
   0x8   : > { %p181_p5 = scmp.lt.s32.totalorder (!%p146_p3), %s719_s15, 3  ;;  %s577_s20 = sshll.u32 (!%p146_p3), %s715_s14, 3  ;;  %v232_v0 = vlaneseq (!%p146_p3)  ;;  %v243_v1 = vstv (!%p146_p3), %s719_s15  ;;  %vm461_vm12 = vcmask (!%p146_p3), 523264  }
   0x9   : > { %s932_s19 = smov (%p28_p4, %s930_s19), 0  ;;  %149 = sbr.rel (%p146_p3) target bundleno = 275 (0x113), region = 28 }
   0xa   : > { %p183_p6 = scmp.lt.s32.totalorder (!%p146_p3), %s577_s20, 15  ;;  %s789_s21 = sld [smem:[#allocation3]] (!%p146_p3)  ;;  %v233_v2 = vshrl.u32 (!%p146_p3), %v232_v0, 7  ;;  %v244_v3 = vmul.u32 (!%p146_p3), 128, %v243_v1  ;;  %v812_v23 = vand.u32 (!%p146_p3), 127, %v232_v0 }
   0xb   : > { %s585_s28 = sshll.u32 (!%p146_p3), %s715_s14, 6 }
   0xc   : > { %v234_v11 = vadd.s32 (!%p146_p3), 8, %v233_v2  ;;  %v245_v12 = vstv (!%p146_p3), %s585_s28  ;;  %v237_v13 = vadd.s32 (!%p146_p3), 32, %v233_v2  ;;  %v238_v19 = vadd.s32 (!%p146_p3), 40, %v233_v2 }
   0xd   : > { %v246_v18 = vadd.s32 (!%p146_p3), %v245_v12, %v244_v3  ;;  %v235_v24 = vadd.s32 (!%p146_p3), 16, %v233_v2  ;;  %v236_v25 = vadd.s32 (!%p146_p3), 24, %v233_v2  ;;  %v239_v30 = vadd.s32 (!%p146_p3), 48, %v233_v2 }
   0xe   : > { %v240_v31 = vadd.s32 (!%p146_p3), 56, %v233_v2 }
   0xf   : > { %v247_v29 = vadd.s32 (!%p146_p3), %v246_v18, %v233_v2  ;;  %v248_v35 = vadd.s32 (!%p146_p3), %v246_v18, %v234_v11  ;;  %v251_v37 = vadd.s32 (!%p146_p3), %v246_v18, %v237_v13  ;;  %v252_v41 = vadd.s32 (!%p146_p3), %v246_v18, %v238_v19 }
  0x10   : > { %s934_s15 = smov (!%p181_p5, %s719_s15), 3  ;;  %s936_s20 = smov (!%p183_p6, %s577_s20), 15  ;;  %v826_v36 = vstv %s789_s21  ;;  %v249_v45 = vadd.s32 %v246_v18, %v235_v24  ;;  %v250_v51 = vadd.s32 %v246_v18, %v236_v25  ;;  %v253_v55 = vadd.s32 %v246_v18, %v239_v30 }
  0x11   : > { %s600_s22 = sshll.u32 %s934_s15, 7  ;;  %s578_s23 = sshll.u32 %s934_s15, 4  ;;  %v255_v40 = vmul.u32 128, %v247_v29  ;;  %v256_v43 = vmul.u32 128, %v248_v35  ;;  %v254_v59 = vadd.s32 %v246_v18, %v240_v31 }
  0x12   : > { %s794_s26 = scalar_lea.vmem %s921_s2, %s600_s22  ;;  %s796_s27 = sadd.s32 %s578_s23, %s936_s20  ;;  %v259_v44 = vmul.u32 128, %v251_v37  ;;  %v260_v50 = vmul.u32 128, %v252_v41 }
  0x13   : > { %v214_v4 = vld [vmem:[%s794_s26] sm:$0xff]  ;;  %v215_v5 = vld [vmem:[%s794_s26 + $0x8] sm:$0xff]  ;;  %v216_v6 = vld [vmem:[%s794_s26 + $0x10] sm:$0xff]  ;;  %s579_s29 = sshll.u32 %s796_s27, 3  ;;  %v263_v49 = vadd.s32 %v255_v40, %v812_v23  ;;  %v264_v52 = vadd.s32 %v256_v43, %v812_v23  ;;  %v257_v54 = vmul.u32 128, %v249_v45  ;;  %v258_v58 = vmul.u32 128, %v250_v51 }
  0x14   : > { %v380_v7 = vpack.c.bf16 %v215_v5, %v214_v4  ;;  %v217_v8 = vld [vmem:[%s794_s26 + $0x18] sm:$0xff]  ;;  %v218_v9 = vld [vmem:[%s794_s26 + $0x20] sm:$0xff]  ;;  %v219_v10 = vld [vmem:[%s794_s26 + $0x28] sm:$0xff]  ;;  %s823_s5 = scalar_lea.vmem %s920_s1, %s579_s29  ;;  %v267_v53 = vadd.s32 %v259_v44, %v812_v23  ;;  %v268_v57 = vadd.s32 %v260_v50, %v812_v23  ;;  %v261_v3 = vmul.u32 128, %v253_v55  ;;  %s203_s8 = scalar_lea.vmem %s922_s3, %s579_s29 }
  0x15   : > { %v381_v14 = vpack.c.bf16 %v217_v8, %v216_v6  ;;  %v220_v15 = vld [vmem:[%s794_s26 + $0x30] sm:$0xff]  ;;  %v221_v16 = vld [vmem:[%s794_s26 + $0x38] sm:$0xff]  ;;  %v222_v17 = vld [vmem:[%s794_s26 + $0x40] sm:$0xff]  ;;  %v382_v26 = vpack.c.bf16 %v219_v10, %v218_v9  ;;  %v271_v56 = vmul.u32 2654435761, %v263_v49  ;;  %v265_v63 = vadd.s32 %v257_v54, %v812_v23 }
  0x16   : > { %613 = vmatprep.subr.bf16.mxu0 %v380_v7  ;;  %637 = vmatprep.subr.bf16.mxu1 %v380_v7  ;;  %v223_v20 = vld [vmem:[%s794_s26 + $0x48] sm:$0xff]  ;;  %v224_v21 = vld [vmem:[%s794_s26 + $0x50] sm:$0xff]  ;;  %v225_v22 = vld [vmem:[%s794_s26 + $0x58] sm:$0xff]  ;;  %v383_v32 = vpack.c.bf16 %v221_v16, %v220_v15  ;;  %v272_v60 = vmul.u32 2654435761, %v264_v52  ;;  %v266_v2 = vadd.s32 %v258_v58, %v812_v23  ;;  %v269_v11 = vadd.s32 %v261_v3, %v812_v23 }
  0x17   : > { %614 = vmatpush3.bf16.msra.mxu0 %v380_v7  ;;  %645 = vmatpush3.bf16.msra.mxu1 %v380_v7  ;;  %v226_v27 = vld [vmem:[%s794_s26 + $0x60] sm:$0xff]  ;;  %v227_v28 = vld [vmem:[%s794_s26 + $0x68] sm:$0xff]  ;;  %v228_v33 = vld [vmem:[%s794_s26 + $0x70] sm:$0xff]  ;;  %v828_v38 = vpack.c.bf16 %v223_v20, %v222_v17  ;;  %v830_v39 = vpack.c.bf16 %v225_v22, %v224_v21  ;;  %v275_v62 = vmul.u32 2654435761, %v267_v53  ;;  %v280_v0 = vadd.s32 %v826_v36, %v271_v56 }
  0x18   : > { %615 = vmatprep.subr.bf16.mxu0 %v381_v14  ;;  %638 = vmatprep.subr.bf16.mxu1 %v381_v14  ;;  %v229_v34 = vld [vmem:[%s794_s26 + $0x78] sm:$0xff]  ;;  %v832_v42 = vpack.c.bf16 %v227_v28, %v226_v27  ;;  %v837_v47 = vld [vmem:[%s823_s5] sm:$0xff]  ;;  %v840_v48 = vld [vmem:[%s823_s5 + $0x8] sm:$0xff]  ;;  %v276_v1 = vmul.u32 2654435761, %v268_v57  ;;  %v281_v4 = vadd.s32 %v826_v36, %v272_v60  ;;  %v262_v7 = vmul.u32 128, %v254_v59 }
  0x19   : > { %v834_v46 = vpack.c.bf16 %v229_v34, %v228_v33  ;;  %v587_v61 = vpack.c.bf16 %v840_v48, %v837_v47  ;;  %v284_v5 = vadd.s32 %v826_v36, %v275_v62  ;;  %v273_v6 = vmul.u32 2654435761, %v265_v63  ;;  %v867_v45 = vld [vmem:[%s823_s5 + $0x20] sm:$0xff] }
  0x1a   : > { %v288_v8 = vshra.s32 %v280_v0, 15  ;;  %v285_v9 = vadd.s32 %v826_v36, %v276_v1  ;;  %v274_v10 = vmul.u32 2654435761, %v266_v2  ;;  %v289_v12 = vshra.s32 %v281_v4, 15 }
  0x1b   : > { %616 = vmatpush3.bf16.msra.mxu0 %v381_v14  ;;  %646 = vmatpush3.bf16.msra.mxu1 %v381_v14  ;;  %v292_v13 = vshra.s32 %v284_v5, 15  ;;  %v282_v14 = vadd.s32 %v826_v36, %v273_v6  ;;  %v270_v15 = vadd.s32 %v262_v7, %v812_v23  ;;  %v277_v19 = vmul.u32 2654435761, %v269_v11 }
  0x1c   : > { %617 = vmatprep.subr.bf16.mxu0 %v382_v26  ;;  %639 = vmatprep.subr.bf16.mxu1 %v382_v26  ;;  %v296_v16 = vxor.u32 %v288_v8, %v280_v0  ;;  %v293_v17 = vshra.s32 %v285_v9, 15  ;;  %v283_v18 = vadd.s32 %v826_v36, %v274_v10  ;;  %v297_v20 = vxor.u32 %v289_v12, %v281_v4 }
  0x1d   : > { %v300_v21 = vxor.u32 %v292_v13, %v284_v5  ;;  %v290_v22 = vshra.s32 %v282_v14, 15  ;;  %v278_v24 = vmul.u32 2654435761, %v270_v15  ;;  %v286_v23 = vadd.s32 %v826_v36, %v277_v19 }
  0x1e   : > { %v304_v25 = vmul.u32 2246822507, %v296_v16  ;;  %v291_v27 = vshra.s32 %v283_v18, 15  ;;  %v305_v28 = vmul.u32 2246822507, %v297_v20 }
  0x1f   : > { %618 = vmatpush3.bf16.msra.mxu0 %v382_v26  ;;  %647 = vmatpush3.bf16.msra.mxu1 %v382_v26  ;;  %v301_v26 = vxor.u32 %v293_v17, %v285_v9  ;;  %v308_v29 = vmul.u32 2246822507, %v300_v21  ;;  %v298_v30 = vxor.u32 %v290_v22, %v282_v14  ;;  %v287_v31 = vadd.s32 %v826_v36, %v278_v24  ;;  %v870_v36 = vld [vmem:[%s823_s5 + $0x28] sm:$0xff]  ;;  %v208_v17 = vld [vmem:[%s823_s5 + $0x10] sm:$0xff] }
  0x20   : > { %619 = vmatprep.subr.bf16.mxu0 %v383_v32  ;;  %640 = vmatprep.subr.bf16.mxu1 %v383_v32  ;;  %v299_v34 = vxor.u32 %v291_v27, %v283_v18  ;;  %v294_v35 = vshra.s32 %v286_v23, 15  ;;  %v313_v37 = vshra.s32 %v305_v28, 13  ;;  %v593_v62 = vpack.c.bf16 %v870_v36, %v867_v45  ;;  %v209_v18 = vld [vmem:[%s823_s5 + $0x18] sm:$0xff] }
  0x21   : > { %v309_v33 = vmul.u32 2246822507, %v301_v26  ;;  %v316_v40 = vshra.s32 %v308_v29, 13  ;;  %v306_v41 = vmul.u32 2246822507, %v298_v30  ;;  %v295_v43 = vshra.s32 %v287_v31, 15 }
  0x22   : > { %v307_v50 = vmul.u32 2246822507, %v299_v34  ;;  %v321_v51 = vxor.u32 %v313_v37, %v305_v28  ;;  %v590_v28 = vpack.c.bf16 %v209_v18, %v208_v17 }
  0x23   : > { %620 = vmatpush3.bf16.msra.mxu0 %v383_v32  ;;  %648 = vmatpush3.bf16.msra.mxu1 %v383_v32  ;;  %v312_v32 = vshra.s32 %v304_v25, 13  ;;  %v317_v49 = vshra.s32 %v309_v33, 13  ;;  %v324_v52 = vxor.u32 %v316_v40, %v308_v29  ;;  %v314_v53 = vshra.s32 %v306_v41, 13 }
  0x24   : > { %621 = vmatprep.subr.bf16.mxu0 %v828_v38  ;;  %641 = vmatprep.subr.bf16.mxu1 %v828_v38  ;;  %v303_v54 = vxor.u32 %v295_v43, %v287_v31  ;;  %v315_v57 = vshra.s32 %v307_v50, 13  ;;  %v329_v59 = vmul.u32 3266489917, %v321_v51 }
  0x25   : > { %v320_v44 = vxor.u32 %v312_v32, %v304_v25  ;;  %v325_v56 = vxor.u32 %v317_v49, %v309_v33  ;;  %v332_v60 = vmul.u32 3266489917, %v324_v52  ;;  %v322_v63 = vxor.u32 %v314_v53, %v306_v41  ;;  %v213_v32 = vld [vmem:[%s823_s5 + $0x38] sm:$0xff] }
  0x26   : > { %v323_v2 = vxor.u32 %v315_v57, %v307_v50  ;;  %v311_v3 = vmul.u32 2246822507, %v303_v54  ;;  %v337_v4 = vshra.s32 %v329_v59, 16 }
  0x27   : > { %622 = vmatpush3.bf16.msra.mxu0 %v828_v38  ;;  %649 = vmatpush3.bf16.msra.mxu1 %v828_v38  ;;  %v302_v38 = vxor.u32 %v294_v35, %v286_v23  ;;  %v328_v55 = vmul.u32 3266489917, %v320_v44  ;;  %v333_v1 = vmul.u32 3266489917, %v325_v56 }
  0x28   : > { %623 = vmatprep.subr.bf16.mxu0 %v830_v39  ;;  %642 = vmatprep.subr.bf16.mxu1 %v830_v39  ;;  %v330_v5 = vmul.u32 3266489917, %v322_v63  ;;  %v331_v9 = vmul.u32 3266489917, %v323_v2  ;;  %v319_v10 = vshra.s32 %v311_v3, 13  ;;  %v345_v11 = vxor.u32 %v337_v4, %v329_v59 }
  0x29   : > { %v310_v58 = vmul.u32 2246822507, %v302_v38  ;;  %v336_v0 = vshra.s32 %v328_v55, 16  ;;  %v341_v8 = vshra.s32 %v333_v1, 16 }
  0x2a   : > { %v338_v13 = vshra.s32 %v330_v5, 16  ;;  %v339_v19 = vshra.s32 %v331_v9, 16  ;;  %v327_v20 = vxor.u32 %v319_v10, %v311_v3  ;;  %v353_v21 = vand.u32 2147483647, %v345_v11 }
  0x2b   : > { %624 = vmatpush3.bf16.msra.mxu0 %v830_v39  ;;  %650 = vmatpush3.bf16.msra.mxu1 %v830_v39  ;;  %v340_v39 = vshra.s32 %v332_v60, 16  ;;  %v318_v6 = vshra.s32 %v310_v58, 13  ;;  %v344_v7 = vxor.u32 %v336_v0, %v328_v55  ;;  %v349_v16 = vxor.u32 %v341_v8, %v333_v1 }
  0x2c   : > { %625 = vmatprep.subr.bf16.mxu0 %v832_v42  ;;  %643 = vmatprep.subr.bf16.mxu1 %v832_v42  ;;  %v346_v22 = vxor.u32 %v338_v13, %v330_v5  ;;  %v347_v26 = vxor.u32 %v339_v19, %v331_v9  ;;  %v335_v27 = vmul.u32 3266489917, %v327_v20  ;;  %vm361_vm1 = vcmp.lt.s32.totalorder %v353_v21, 1932735283 }
  0x2d   : > { %v348_v12 = vxor.u32 %v340_v39, %v332_v60  ;;  %v326_v14 = vxor.u32 %v318_v6, %v310_v58  ;;  %v352_v15 = vand.u32 2147483647, %v344_v7  ;;  %v357_v25 = vand.u32 2147483647, %v349_v16 }
  0x2e   : > { %v354_v23 = vand.u32 2147483647, %v346_v22  ;;  %v355_v29 = vand.u32 2147483647, %v347_v26  ;;  %v343_v31 = vshra.s32 %v335_v27, 16 }
  0x2f   : > { %626 = vmatpush3.bf16.msra.mxu0 %v832_v42  ;;  %651 = vmatpush3.bf16.msra.mxu1 %v832_v42  ;;  %v356_v42 = vand.u32 2147483647, %v348_v12  ;;  %v334_v24 = vmul.u32 3266489917, %v326_v14  ;;  %vm360_vm0 = vcmp.lt.s32.totalorder %v352_v15, 1932735283 }
  0x30   : > { %627 = vmatprep.subr.bf16.mxu0 %v834_v46  ;;  %644 = vmatprep.subr.bf16.mxu1 %v834_v46  ;;  %vm586_vm3 = vmpackc.low %vm361_vm1, %vm360_vm0  ;;  %vm365_vm4 = vcmp.lt.s32.totalorder %v357_v25, 1932735283  ;;  %vm362_vm6 = vcmp.lt.s32.totalorder %v354_v23, 1932735283  ;;  %vm363_vm7 = vcmp.lt.s32.totalorder %v355_v29, 1932735283  ;;  %v351_v34 = vxor.u32 %v343_v31, %v335_v27 }
  0x31   : > { %vm364_vm2 = vcmp.lt.s32.totalorder %v356_v42, 1932735283  ;;  %v342_v30 = vshra.s32 %v334_v24, 16  ;;  %629 = vmatprep.mubr.msk.bf16.mxu0 %vm586_vm3, %v587_v61  ;;  %vm589_vm8 = vmpackc.low %vm363_vm7, %vm362_vm6 }
  0x32   : > { %vm592_vm5 = vmpackc.low %vm365_vm4, %vm364_vm2  ;;  %v359_v37 = vand.u32 2147483647, %v351_v34 }
  0x33   : > { %628 = vmatpush3.bf16.msra.mxu0 %v834_v46  ;;  %652 = vmatpush3.bf16.msra.mxu1 %v834_v46  ;;  %v212_v46 = vld [vmem:[%s823_s5 + $0x30] sm:$0xff]  ;;  %v350_v33 = vxor.u32 %v342_v30, %v334_v24 }
  0x34   : > { %633 = vmatprep.mubr.msk.bf16.mxu1 %vm592_vm5, %v593_v62  ;;  %v596_v40 = vpack.c.bf16 %v213_v32, %v212_v46  ;;  %vm367_vm10 = vcmp.lt.s32.totalorder %v359_v37, 1932735283 }
  0x35   : > { %v358_v35 = vand.u32 2147483647, %v350_v33 }
  0x36   : > { %630 = vmatmul.mubr.msk.bf16.vlgmr.msra.gmra.mrb[0].mxu0 %vm589_vm8, %v590_v28 }
  0x37   : > { %vm366_vm9 = vcmp.lt.s32.totalorder %v358_v35, 1932735283 }
  0x38   : > { %vm595_vm11 = vmpackc.low %vm367_vm10, %vm366_vm9 }
  0x39   : > { %634 = vmatmul.mubr.msk.bf16.vlgmr.msra.gmra.mrb[0].mxu1 %vm595_vm11, %v596_v40 }
 0x109   : > { %v631_v47 = vpop.f32.mrb[0].mxu0 }
 0x10a   : > { %v455_v48 = vmul.f32 1.1111112, %v631_v47  ;;  %v422_v61 = vpop.f32.mrb[1].mxu0 }
 0x10b   : > { %v453_v41 = vmul.f32 1.1111112, %v422_v61  ;;  %v632_v43 = vpop.f32.mrb[2].mxu0 }
 0x10c   : > { %464 = vst.msk [vmem:[%s203_s8 + $0x10] sm:$0xff] %vm461_vm12, %v455_v48  ;;  %v456_v44 = vmul.f32 1.1111112, %v632_v43  ;;  %v425_v45 = vpop.f32.mrb[3].mxu0  ;;  %v635_v36 = vpop.f32.mrb[0].mxu1 }
 0x10d   : > { %462 = vst.msk [vmem:[%s203_s8] sm:$0xff] %vm461_vm12, %v453_v41  ;;  %v454_v49 = vmul.f32 1.1111112, %v425_v45  ;;  %v459_v50 = vmul.f32 1.1111112, %v635_v36  ;;  %v438_v38 = vpop.f32.mrb[1].mxu1 }
 0x10e   : > { %465 = vst.msk [vmem:[%s203_s8 + $0x18] sm:$0xff] %vm461_vm12, %v456_v44  ;;  %v457_v51 = vmul.f32 1.1111112, %v438_v38  ;;  %v636_v52 = vpop.f32.mrb[2].mxu1 }
 0x10f   : > { %463 = vst.msk [vmem:[%s203_s8 + $0x8] sm:$0xff] %vm461_vm12, %v454_v49  ;;  %468 = vst.msk [vmem:[%s203_s8 + $0x30] sm:$0xff] %vm461_vm12, %v459_v50  ;;  %v460_v53 = vmul.f32 1.1111112, %v636_v52  ;;  %v441_v54 = vpop.f32.mrb[3].mxu1 }
 0x110   : > { %466 = vst.msk [vmem:[%s203_s8 + $0x20] sm:$0xff] %vm461_vm12, %v457_v51  ;;  %v458_v55 = vmul.f32 1.1111112, %v441_v54 }
 0x111   : > { %469 = vst.msk [vmem:[%s203_s8 + $0x38] sm:$0xff] %vm461_vm12, %v460_v53 }
 0x112   : > { %467 = vst.msk [vmem:[%s203_s8 + $0x28] sm:$0xff] %vm461_vm12, %v458_v55 }
 0x113 PF: > { %s14_s18 = sadd.s32 1, %s731_s18   ;;  %s923_s14 = smov %s723_s16 }
 0x114   : > { %p11_p7 = scmp.ge.s32.totalorder %s14_s18, 10   ;;  %s924_s15 = smov %s727_s17 }
 0x115   : > { %s925_s16 = smov %s928_s0  ;;  %s926_s17 = smov %s932_s19 }
 0x116   :  { %13 = sbr.rel (!%p11_p7) target bundleno = 3 (0x3), region = 61 }

</bundles_post_ra>
